<compile_context>
chip_gen: v7x
topology: tpu7x:2x2x1
jax: 0.10.0
libtpu: 0.0.40
codegen_flags: <defaults>
</compile_context>

<pallas_src>
import math

import jax
import jax.numpy as jnp
from jax.experimental import pallas as pl
from jax.experimental.pallas import tpu as pltpu


def _round_up(x, m):
    return ((x + m - 1) // m) * m


def valuenet_kernel(x_ref, w1_ref, b1_ref, w2_ref, b2_ref, w3_ref, b3_ref, o_ref):
    # x_ref: (TB, state_dim) f32 tile of the batch. Cast to the matmul dtype
    # (bf16 by default) on the VPU, hidden under MXU work.
    x = x_ref[...].astype(w1_ref.dtype)

    # Layer 1 + ReLU (MXU, f32 accumulation; bias/ReLU in f32).
    h1 = jnp.dot(x, w1_ref[...], preferred_element_type=jnp.float32) + b1_ref[...]
    h1 = jnp.maximum(h1, 0.0)

    # Layer 2 + ReLU. Only the dot operand is cast to the weight dtype; the
    # elementwise math stays in f32 vregs.
    h2 = jnp.dot(h1.astype(w2_ref.dtype), w2_ref[...],
                 preferred_element_type=jnp.float32) + b2_ref[...]
    h2 = jnp.maximum(h2, 0.0)

    # Layer 3 (128 -> 1): VPU broadcast-multiply with the (1, 128) weight row +
    # XLU lane reduction (both slots otherwise idle); skip the MXU entirely.
    v = jnp.sum(h2 * w3_ref[...], axis=-1) + b3_ref[0, 0]          # (TB,)

    # Lane-dense store: one (1, 1, TB) row per tile instead of a (TB, 1) column.
    o_ref[...] = v[None, None, :].astype(o_ref.dtype)


def value_net_forward(state, params, *, tb=2048, use_bf16=True, vmem_limit_bytes=None):
    """state: (B, state_dim) float32. params: dict of w1,b1,w2,b2,w3,b3.

    tb:        batch-tile rows per grid step (rounded to a multiple of 8).
    use_bf16:  use bf16 MXU operands (f32 accumulation). Default True.
    """
    B, state_dim = state.shape
    w1, b1 = params["w1"], params["b1"]
    w2, b2 = params["w2"], params["b2"]
    w3, b3 = params["w3"], params["b3"]
    H = w1.shape[1]                              # hidden width (128)

    w3_row = w3.reshape(1, H).astype(jnp.float32)  # (128,1) column -> (1,128) row
    b3_s = b3.reshape(1, 1).astype(jnp.float32)    # scalar, lives in SMEM

    # One-time cast of the tiny resident weights; state stays f32 in HBM and is
    # cast inside the kernel.
    mm_dtype = jnp.bfloat16 if use_bf16 else w1.dtype
    w1m = w1.astype(mm_dtype)
    w2m = w2.astype(mm_dtype)

    # Batch tile: multiple of 8 (f32 sublane), capped by the (rounded-up) batch.
    tb_eff = _round_up(min(tb, _round_up(B, 8)), 8)
    num_tiles = pl.cdiv(B, tb_eff)               # partial last block handled by Pallas
    grid = (num_tiles,)

    # Rough per-step VMEM footprint; only raise the scoped-VMEM limit when a
    # very large TB could exceed the smallest default (16 MiB on v5e). Keep it
    # capped below v7x's 64 MiB physical VMEM.
    if vmem_limit_bytes is None:
        footprint = (2 * tb_eff * state_dim * jnp.dtype(mm_dtype).itemsize  # x double-buffer
                     + 2 * tb_eff * H * 4                                    # h1/h2 f32 temps
                     + (state_dim * H + H * H) * jnp.dtype(mm_dtype).itemsize
                     + 4 * H * 4                                             # biases / w3 row
                     + 2 * tb_eff * 4)                                       # output double-buffer
        if footprint > 12 * 1024 * 1024:
            vmem_limit_bytes = min(2 * footprint, 60 * 1024 * 1024)

    out = pl.pallas_call(
        valuenet_kernel,
        out_shape=jax.ShapeDtypeStruct((num_tiles, 1, tb_eff), jnp.float32),
        grid=grid,
        in_specs=[
            pl.BlockSpec((tb_eff, state_dim), lambda i: (i, 0)),   # state tile (streamed f32)
            pl.BlockSpec((state_dim, H), lambda i: (0, 0)),        # w1  (resident)
            pl.BlockSpec((1, H), lambda i: (0, 0)),                # b1  (resident)
            pl.BlockSpec((H, H), lambda i: (0, 0)),                # w2  (resident)
            pl.BlockSpec((1, H), lambda i: (0, 0)),                # b2  (resident)
            pl.BlockSpec((1, H), lambda i: (0, 0)),                # w3 row (resident)
            pl.BlockSpec(memory_space=pltpu.MemorySpace.SMEM),     # b3 scalar in SMEM
        ],
        out_specs=pl.BlockSpec((1, 1, tb_eff), lambda i: (i, 0, 0)),
        compiler_params=pltpu.CompilerParams(
            dimension_semantics=("parallel",),                     # megacore sharding on v7x
            vmem_limit_bytes=vmem_limit_bytes),
    )(state, w1m, b1, w2m, b2, w3_row, b3_s)

    # (num_tiles, 1, TB) lane-dense rows -> (B, 1); padded tail rows sliced off.
    return out.reshape(-1, 1)[:B]


def init_value_net_params(key, state_dim, edge=0.003):
    """PyTorch nn.Linear-style init + the edge override on linear3.
    Weights are stored as (in, out) = PyTorch weight transposed."""
    k1, k2, k3, k4, k5, k6 = jax.random.split(key, 6)

    def linear_init(kw, kb, fan_in, fan_out, bound=None):
        if bound is None:
            bound = 1.0 / math.sqrt(fan_in)
        w = jax.random.uniform(kw, (fan_in, fan_out), jnp.float32, -bound, bound)
        b = jax.random.uniform(kb, (1, fan_out), jnp.float32, -bound, bound)
        return w, b

    w1, b1 = linear_init(k1, k2, state_dim, 128)
    w2, b2 = linear_init(k3, k4, 128, 128)
    w3, b3 = linear_init(k5, k6, 128, 1, bound=edge)   # linear3 .uniform_(-edge, edge)
    return {"w1": w1, "b1": b1, "w2": w2, "b2": b2, "w3": w3, "b3": b3}


def value_net_reference(state, params):
    h1 = jnp.maximum(state @ params["w1"] + params["b1"], 0.0)
    h2 = jnp.maximum(h1 @ params["w2"] + params["b2"], 0.0)
    return h2 @ params["w3"] + params["b3"]


if __name__ == "__main__":
    key = jax.random.PRNGKey(0)
    k_params, k_state = jax.random.split(key)

    state_dim = 32
    params = init_value_net_params(k_params, state_dim)

    # 1) Small demo batch, f32 mode (single tile) — tight tolerance.
    state = jax.random.normal(k_state, (8, state_dim), jnp.float32)
    ref = value_net_reference(state, params)
    out = jax.block_until_ready(value_net_forward(state, params, use_bf16=False))
    assert out.shape == (8, 1), out.shape
    assert jnp.allclose(out, ref, atol=1e-5, rtol=1e-5), "mismatch vs JAX reference (B=8, f32)"

    # 2) Multi-tile, ragged batch in f32 mode (exercises the cdiv grid, the
    #    partial last input block and the lane-dense output re-slicing).
    state2 = jax.random.normal(jax.random.PRNGKey(1), (300, state_dim), jnp.float32)
    ref2 = value_net_reference(state2, params)
    out2 = jax.block_until_ready(value_net_forward(state2, params, tb=128, use_bf16=False))
    assert out2.shape == (300, 1), out2.shape
    assert jnp.allclose(out2, ref2, atol=1e-5, rtol=1e-5), "mismatch vs JAX reference (B=300, f32)"

    # 3) Default path: bf16 matmul operands (f32 accumulation), in-kernel cast
    #    of the streamed f32 state — loose tolerance for bf16 operand rounding.
    out3 = jax.block_until_ready(value_net_forward(state2, params, tb=128))
    assert out3.shape == (300, 1), out3.shape
    assert float(jnp.max(jnp.abs(out3 - ref2))) < 5e-2, "bf16 path drifted too far"

    # 4) Default large tile (tb=2048 capped to the small batch) end-to-end.
    out4 = jax.block_until_ready(value_net_forward(state2, params))
    assert out4.shape == (300, 1), out4.shape
    assert float(jnp.max(jnp.abs(out4 - ref2))) < 5e-2, "default-tile path drifted too far"

    print("KERNEL_OK")
</pallas_src>

<mosaic_0001>
module attributes {stable_mosaic.version = 11 : i64} {
  func.func @valuenet_kernel(%arg0: i32, %arg1: memref<8x32xf32, #tpu.memory_space<vmem>>, %arg2: memref<32x128xf32, #tpu.memory_space<vmem>>, %arg3: memref<1x128xf32, #tpu.memory_space<vmem>>, %arg4: memref<128x128xf32, #tpu.memory_space<vmem>>, %arg5: memref<1x128xf32, #tpu.memory_space<vmem>>, %arg6: memref<1x128xf32, #tpu.memory_space<vmem>>, %arg7: memref<1x1xf32, #tpu.memory_space<smem>>, %arg8: memref<1x1x8xf32, #tpu.memory_space<vmem>>) attributes {dimension_semantics = [#tpu.dimension_semantics<parallel>], iteration_bounds = array<i64: 1>, scalar_prefetch = 0 : i64, scratch_operands = 0 : i64, tpu.core_type = #tpu.core_type<tc>, window_params = [{transform_indices = @transform_0, window_bounds = array<i64: 8, 32>}, {pipeline_mode = #tpu.pipeline_mode<synchronous>, transform_indices = @transform_1, window_bounds = array<i64: 32, 128>}, {pipeline_mode = #tpu.pipeline_mode<synchronous>, transform_indices = @transform_2, window_bounds = array<i64: 1, 128>}, {pipeline_mode = #tpu.pipeline_mode<synchronous>, transform_indices = @transform_3, window_bounds = array<i64: 128, 128>}, {pipeline_mode = #tpu.pipeline_mode<synchronous>, transform_indices = @transform_4, window_bounds = array<i64: 1, 128>}, {pipeline_mode = #tpu.pipeline_mode<synchronous>, transform_indices = @transform_5, window_bounds = array<i64: 1, 128>}, {transform_indices = @transform_6, window_bounds = array<i64: 1, 1>}, {transform_indices = @transform_7, window_bounds = array<i64: 1, 1, 8>}]} {
    %c0 = arith.constant 0 : index
    %c0_0 = arith.constant 0 : index
    %0 = vector.load %arg1[%c0, %c0_0] : memref<8x32xf32, #tpu.memory_space<vmem>>, vector<8x32xf32>
    %c0_1 = arith.constant 0 : index
    %c0_2 = arith.constant 0 : index
    %1 = vector.load %arg2[%c0_1, %c0_2] : memref<32x128xf32, #tpu.memory_space<vmem>>, vector<32x128xf32>
    %cst = arith.constant dense<0.000000e+00> : vector<8x128xf32>
    %2 = tpu.matmul %0, %1, %cst {dimension_numbers = #tpu.dot_dimension_numbers<[1], [0], [0], [1], [0, 0, 1, 1], [], []>} : vector<8x32xf32>, vector<32x128xf32>, vector<8x128xf32> -> vector<8x128xf32>
    %c0_3 = arith.constant 0 : index
    %c0_4 = arith.constant 0 : index
    %3 = vector.load %arg3[%c0_3, %c0_4] : memref<1x128xf32, #tpu.memory_space<vmem>>, vector<1x128xf32>
    %4 = vector.broadcast %3 : vector<1x128xf32> to vector<8x128xf32>
    %5 = arith.addf %2, %4 : vector<8x128xf32>
    %cst_5 = arith.constant 0.000000e+00 : f32
    %6 = vector.broadcast %cst_5 : f32 to vector<8x128xf32>
    %7 = arith.maximumf %5, %6 : vector<8x128xf32>
    %c0_6 = arith.constant 0 : index
    %c0_7 = arith.constant 0 : index
    %8 = vector.load %arg4[%c0_6, %c0_7] : memref<128x128xf32, #tpu.memory_space<vmem>>, vector<128x128xf32>
    %cst_8 = arith.constant dense<0.000000e+00> : vector<8x128xf32>
    %9 = tpu.matmul %7, %8, %cst_8 {dimension_numbers = #tpu.dot_dimension_numbers<[1], [0], [0], [1], [0, 0, 1, 1], [], []>} : vector<8x128xf32>, vector<128x128xf32>, vector<8x128xf32> -> vector<8x128xf32>
    %c0_9 = arith.constant 0 : index
    %c0_10 = arith.constant 0 : index
    %10 = vector.load %arg5[%c0_9, %c0_10] : memref<1x128xf32, #tpu.memory_space<vmem>>, vector<1x128xf32>
    %11 = vector.broadcast %10 : vector<1x128xf32> to vector<8x128xf32>
    %12 = arith.addf %9, %11 : vector<8x128xf32>
    %cst_11 = arith.constant 0.000000e+00 : f32
    %13 = vector.broadcast %cst_11 : f32 to vector<8x128xf32>
    %14 = arith.maximumf %12, %13 : vector<8x128xf32>
    %c0_12 = arith.constant 0 : index
    %c0_13 = arith.constant 0 : index
    %15 = vector.load %arg6[%c0_12, %c0_13] : memref<1x128xf32, #tpu.memory_space<vmem>>, vector<1x128xf32>
    %16 = vector.broadcast %15 : vector<1x128xf32> to vector<8x128xf32>
    %17 = arith.mulf %14, %16 : vector<8x128xf32>
    %cst_14 = arith.constant dense<0.000000e+00> : vector<8xf32>
    %18 = vector.multi_reduction <add>, %17, %cst_14 [1] : vector<8x128xf32> to vector<8xf32>
    %c0_15 = arith.constant 0 : index
    %c0_16 = arith.constant 0 : index
    %19 = memref.load %arg7[%c0_15, %c0_16] : memref<1x1xf32, #tpu.memory_space<smem>>
    %20 = vector.broadcast %19 : f32 to vector<8xf32>
    %21 = arith.addf %18, %20 : vector<8xf32>
    %22 = vector.shape_cast %21 : vector<8xf32> to vector<1x1x8xf32>
    %c0_17 = arith.constant 0 : index
    %c0_18 = arith.constant 0 : index
    %c0_19 = arith.constant 0 : index
    %23 = vector.load %arg8[%c0_17, %c0_18, %c0_19] : memref<1x1x8xf32, #tpu.memory_space<vmem>>, vector<1x1x8xf32>
    tpu.vector_store %arg8[%c0_17, %c0_18, %c0_19], %22 {strides = array<i32>} : memref<1x1x8xf32, #tpu.memory_space<vmem>>, vector<1x1x8xf32>,
    return
  }
  func.func @transform_0(%arg0: i32) -> (i32, i32) {
    %c0_i32 = arith.constant 0 : i32
    %c0_i32_0 = arith.constant 0 : i32
    return %arg0, %c0_i32 : i32, i32
  }
  func.func @transform_1(%arg0: i32) -> (i32, i32) {
    %c0_i32 = arith.constant 0 : i32
    %c0_i32_0 = arith.constant 0 : i32
    %c0_i32_1 = arith.constant 0 : i32
    return %c0_i32, %c0_i32_0 : i32, i32
  }
  func.func @transform_2(%arg0: i32) -> (i32, i32) {
    %c0_i32 = arith.constant 0 : i32
    %c0_i32_0 = arith.constant 0 : i32
    %c0_i32_1 = arith.constant 0 : i32
    return %c0_i32, %c0_i32_0 : i32, i32
  }
  func.func @transform_3(%arg0: i32) -> (i32, i32) {
    %c0_i32 = arith.constant 0 : i32
    %c0_i32_0 = arith.constant 0 : i32
    %c0_i32_1 = arith.constant 0 : i32
    return %c0_i32, %c0_i32_0 : i32, i32
  }
  func.func @transform_4(%arg0: i32) -> (i32, i32) {
    %c0_i32 = arith.constant 0 : i32
    %c0_i32_0 = arith.constant 0 : i32
    %c0_i32_1 = arith.constant 0 : i32
    return %c0_i32, %c0_i32_0 : i32, i32
  }
  func.func @transform_5(%arg0: i32) -> (i32, i32) {
    %c0_i32 = arith.constant 0 : i32
    %c0_i32_0 = arith.constant 0 : i32
    %c0_i32_1 = arith.constant 0 : i32
    return %c0_i32, %c0_i32_0 : i32, i32
  }
  func.func @transform_6(%arg0: i32) -> (i32, i32) {
    %c0_i32 = arith.constant 0 : i32
    %c0_i32_0 = arith.constant 0 : i32
    %c0_i32_1 = arith.constant 0 : i32
    return %c0_i32, %c0_i32_0 : i32, i32
  }
  func.func @transform_7(%arg0: i32) -> (i32, i32, i32) {
    %c0_i32 = arith.constant 0 : i32
    %c0_i32_0 = arith.constant 0 : i32
    %c0_i32_1 = arith.constant 0 : i32
    return %arg0, %c0_i32, %c0_i32_0 : i32, i32, i32
  }
}

</mosaic_0001>

<bundles_post_ra>
// kernel: tpu_custom_call.1
= control target key start
LH: loop header
LB: loop body
LE: loop exit
PB: predicated region body
PF: predicated region fallthrough
CT: control target
= control target key end

     0   :  { %13 = vsyncpa [#allocation4], 0  ;;  %s607_s0 = inlined_call_operand.hbm [shape: f32[8,32], index: 0, kind: input, shape index: {}]   ;;  %s608_s1 = inlined_call_operand.hbm [shape: f32[32,128], index: 1, kind: input, shape index: {}]   ;;  %s609_s2 = inlined_call_operand.vmem [shape: f32[1,128], index: 2, kind: input, shape index: {}]   ;;  %s610_s3 = inlined_call_operand.hbm [shape: f32[128,128], index: 3, kind: input, shape index: {}]   ;;  %s611_s4 = inlined_call_operand.vmem [shape: f32[1,128], index: 4, kind: input, shape index: {}]   ;;  %s612_s5 = inlined_call_operand.vmem [shape: f32[1,128], index: 5, kind: input, shape index: {}]   ;;  %s613_s6 = inlined_call_operand.<no memory space> [shape: f32[1,1], index: 6, kind: input, shape index: {}]   ;;  %s614_s7 = inlined_call_operand.hbm [shape: f32[1,1,8], index: 7, kind: output, shape index: {}]  }
   0x1   :  { %14 = vsyncpa [#allocation7], 0 }
   0x2   :  { %15 = vsyncpa [#allocation5], 0  ;;  %s492_s24 = smov [#allocation6]   ;;  %s398_s28 = scalar_lea.hbm %s608_s1, 512 }
   0x3   :  { %s31_s25 = sshll.u32 %s492_s24, 4  ;;  %p399_p0 = scmp.ne.s32.totalorder %s608_s1, %s398_s28  ;;  %s32_s25 = int_to_ptr.vmem [resolvable:$true] %s31_s25 }
   0x4   :  { %p402_p1 = scmp.lt.u32.totalorder %s398_s28, %s608_s1 }
   0x6   :  { %p404_p2 = pnand %p402_p1, %p399_p0 }
   0x8   :  { %407 = shalt.err (!%p404_p2)
}
   0x9   :  { %s408_s10 = scalar_lea.vmem %s32_s25, 512  ;;  %p413_p4 = scmp.lt.s32.totalorder %s32_s25, %s32_s25 }
   0xa   :  { %p409_p3 = scmp.ne.s32.totalorder %s32_s25, %s408_s10  ;;  %p414_p5 = scmp.lt.s32.totalorder %s408_s10, %s408_s10 }
   0xc   :  { %p415_p6 = por %p414_p5, %p413_p4 }
   0xe   :  { %p416_p7 = pnand %p415_p6, %p409_p3 }
  0x10   :  { %419 = shalt.err (!%p416_p7)
}
  0x11   :  { %s493_s11 = smov 128   ;;  %s494_s12 = smov 8  }
  0x12   :  { %37 = dma.hbm_to_vmem [thread:$0]  %s608_s1, 512, %s32_s25, [#allocation7], %s493_s11, %s493_s11, %s494_s12  }
  0x13   :  { %s495_s15 = smov [#allocation3]   ;;  %s496_s17 = smov [#allocation8]  }
  0x14   :  { %s22_s16 = sshll.u32 %s495_s15, 4  ;;  %s45_s18 = sshll.u32 %s496_s17, 4  ;;  %s23_s16 = int_to_ptr.vmem [resolvable:$true] %s22_s16  ;;  %s46_s18 = int_to_ptr.vmem [resolvable:$true] %s45_s18 }
  0x15   :  { %s420_s21 = scalar_lea.hbm %s607_s0, 128 }
  0x16   :  { %p421_p8 = scmp.ne.s32.totalorder %s607_s0, %s420_s21  ;;  %p424_p9 = scmp.lt.u32.totalorder %s420_s21, %s607_s0 }
  0x18   :  { %p426_p10 = pnand %p424_p9, %p421_p8 }
  0x1a   :  { %429 = shalt.err (!%p426_p10)
}
  0x1b   :  { %s430_s1 = scalar_lea.vmem %s23_s16, 128  ;;  %p435_p12 = scmp.lt.s32.totalorder %s23_s16, %s23_s16 }
  0x1c   :  { %p431_p11 = scmp.ne.s32.totalorder %s23_s16, %s430_s1  ;;  %p436_p13 = scmp.lt.s32.totalorder %s430_s1, %s430_s1 }
  0x1e   :  { %p437_p0 = por %p436_p13, %p435_p12 }
  0x20   :  { %p438_p1 = pnand %p437_p0, %p431_p11 }
  0x22   :  { %441 = shalt.err (!%p438_p1)
}
  0x23   :  { %25 = dma.hbm_to_vmem [thread:$0]  %s607_s0, 128, %s23_s16, [#allocation4]  }
  0x24   :  { %s442_s30 = scalar_lea.hbm %s610_s3, 2048 }
  0x25   :  { %p443_p2 = scmp.ne.s32.totalorder %s610_s3, %s442_s30  ;;  %p446_p3 = scmp.lt.u32.totalorder %s442_s30, %s610_s3 }
  0x27   :  { %p448_p4 = pnand %p446_p3, %p443_p2 }
  0x29   :  { %451 = shalt.err (!%p448_p4)
}
  0x2a   :  { %s452_s14 = scalar_lea.vmem %s46_s18, 2048  ;;  %p457_p6 = scmp.lt.s32.totalorder %s46_s18, %s46_s18 }
  0x2b   :  { %p453_p5 = scmp.ne.s32.totalorder %s46_s18, %s452_s14  ;;  %p458_p7 = scmp.lt.s32.totalorder %s452_s14, %s452_s14 }
  0x2d   :  { %p459_p8 = por %p458_p7, %p457_p6 }
  0x2f   :  { %p460_p9 = pnand %p459_p8, %p453_p5 }
  0x31   :  { %463 = shalt.err (!%p460_p9)
}
  0x32   :  { %51 = dma.hbm_to_vmem [thread:$0]  %s610_s3, 2048, %s46_s18, [#allocation7], %s493_s11, %s493_s11, %s494_s12  }
  0x33   :  { %486 = dma.done.wait [#allocation4], 128  }
  0x34   :  { %487 = vsyncadd [#allocation4], 4294967168 }
  0x35   :  { %488 = dma.done.wait [#allocation7], 2560  }
  0x36   :  { %489 = vsyncadd [#allocation7], 4294964736  ;;  %v497_v0 = vmov 0.0|0.0   ;;  %vm498_vm0 = vmmov 0   ;;  %v499_v1 = vmov 0.0   ;;  %v68_v2 = vld [vmem:[#allocation6] sm:$0xff]  ;;  %v262_v45 = vlaneseq }
  0x37   :  { %359 = vmatprep.subr.bf16.mxu0 %v497_v0  ;;  %321 = vmatprep.mubr.msk.f32.mxu0 %vm498_vm0, %v499_v1  ;;  %v69_v3 = vld [vmem:[#allocation6 + $0x8] sm:$0xff]  ;;  %v70_v4 = vld [vmem:[#allocation6 + $0x10] sm:$0xff]  ;;  %v71_v6 = vld [vmem:[#allocation6 + $0x18] sm:$0xff]  ;;  %vm79_vm1 = vcmask 261120   ;;  %v259_v48 = vstv %s613_s6  ;;  %vm269_vm2 = vcmask 57344  }
  0x38   :  { %365 = vmatprep.subr.bf16.mxu1 %v497_v0  ;;  %356 = vmatprep.mubr.msk.f32.mxu1 %vm498_vm0, %v499_v1  ;;  %v360_v5 = vpack.c.bf16 %v69_v3, %v68_v2  ;;  %v154_v7 = vld [vmem:[#allocation8] sm:$0xff]  ;;  %v155_v8 = vld [vmem:[#allocation8 + $0x8] sm:$0xff]  ;;  %v156_v9 = vld [vmem:[#allocation8 + $0x10] sm:$0xff]  ;;  %v363_v11 = vpack.c.bf16 %v71_v6, %v70_v4  ;;  %v263_v46 = vand.u32 127, %v262_v45  ;;  %v265_v47 = vshrl.u32 %v262_v45, 7 }
  0x39   :  { %v157_v10 = vld [vmem:[#allocation8 + $0x18] sm:$0xff]  ;;  %v366_v12 = vpack.c.bf16 %v155_v8, %v154_v7  ;;  %v158_v14 = vld [vmem:[#allocation8 + $0x20] sm:$0xff]  ;;  %v159_v15 = vld [vmem:[#allocation8 + $0x28] sm:$0xff] }
  0x3a   :  { %361 = vmatpush3.bf16.msra.mxu0 %v360_v5  ;;  %v369_v13 = vpack.c.bf16 %v157_v10, %v156_v9  ;;  %v67_v16 = vld [vmem:[#allocation3] sm:$0xff]  ;;  %v372_v17 = vpack.c.bf16 %v159_v15, %v158_v14  ;;  %v160_v18 = vld [vmem:[#allocation8 + $0x30] sm:$0xff]  ;;  %v162_v21 = vld [vmem:[#allocation8 + $0x40] sm:$0xff]  ;;  %v266_v49 = vsub.s32 %v263_v46, %v265_v47 }
  0x3b   :  { %362 = vmatprep.subr.bf16.mxu0 %v497_v0  ;;  %367 = vmatpush3.bf16.msra.mxu1 %v366_v12  ;;  %v161_v19 = vld [vmem:[#allocation8 + $0x38] sm:$0xff]  ;;  %v163_v22 = vld [vmem:[#allocation8 + $0x48] sm:$0xff]  ;;  %v164_v24 = vld [vmem:[#allocation8 + $0x50] sm:$0xff] }
  0x3c   :  { %368 = vmatprep.subr.bf16.mxu1 %v497_v0  ;;  %v375_v20 = vpack.c.bf16 %v161_v19, %v160_v18  ;;  %v378_v23 = vpack.c.bf16 %v163_v22, %v162_v21  ;;  %v165_v25 = vld [vmem:[#allocation8 + $0x58] sm:$0xff]  ;;  %v166_v27 = vld [vmem:[#allocation8 + $0x60] sm:$0xff]  ;;  %v167_v28 = vld [vmem:[#allocation8 + $0x68] sm:$0xff] }
  0x3d   :  { %v381_v26 = vpack.c.bf16 %v165_v25, %v164_v24  ;;  %v384_v29 = vpack.c.bf16 %v167_v28, %v166_v27  ;;  %v168_v30 = vld [vmem:[#allocation8 + $0x70] sm:$0xff]  ;;  %v169_v31 = vld [vmem:[#allocation8 + $0x78] sm:$0xff] }
  0x3e   :  { %364 = vmatpush3.bf16.msra.mxu0 %v363_v11  ;;  %v387_v32 = vpack.c.bf16 %v169_v31, %v168_v30  ;;  %v287_v33 = vld [vmem:[%s609_s2] ss:$0 sm:$0xff] }
  0x3f   :  { %370 = vmatpush3.bf16.msra.mxu1 %v369_v13  ;;  %v289_v38 = vld [vmem:[%s611_s4] ss:$0 sm:$0xff]  ;;  %s500_s4 = smov [#allocation9]  }
  0x40   :  { %371 = vmatprep.subr.bf16.mxu1 %v497_v0  ;;  %v290_v42 = vld [vmem:[%s612_s5] ss:$0 sm:$0xff]  ;;  %s277_s20 = sshll.u32 %s500_s4, 4  ;;  %s278_s20 = int_to_ptr.vmem [resolvable:$true] %s277_s20 }
  0x41   :  { %322 = vmatmul.mubr.msk.f32.vlgmr.msra.gmra.mrb[0].mxu0 %vm79_vm1, %v67_v16  ;;  %s464_s5 = scalar_lea.vmem %s278_s20, 16  ;;  %s468_s21 = scalar_lea.vmem %s278_s20, 32 }
  0x42   :  { %p465_p10 = scmp.ne.s32.totalorder %s278_s20, %s464_s5  ;;  %p469_p11 = scmp.lt.s32.totalorder %s278_s20, %s278_s20 }
  0x43   :  { %373 = vmatpush3.bf16.msra.mxu1 %v372_v17  ;;  %p470_p12 = scmp.lt.s32.totalorder %s468_s21, %s464_s5 }
  0x44   :  { %374 = vmatprep.subr.bf16.mxu1 %v497_v0 }
  0x45   :  { %p471_p13 = por %p470_p12, %p469_p11 }
  0x47   :  { %376 = vmatpush3.bf16.msra.mxu1 %v375_v20  ;;  %p472_p0 = pnand %p471_p13, %p465_p10 }
  0x48   :  { %377 = vmatprep.subr.bf16.mxu1 %v497_v0 }
  0x4b   :  { %379 = vmatpush3.bf16.msra.mxu1 %v378_v23 }
  0x4c   :  { %380 = vmatprep.subr.bf16.mxu1 %v497_v0 }
  0x4f   :  { %382 = vmatpush3.bf16.msra.mxu1 %v381_v26 }
  0x50   :  { %383 = vmatprep.subr.bf16.mxu1 %v497_v0 }
  0x53   :  { %385 = vmatpush3.bf16.msra.mxu1 %v384_v29 }
  0x54   :  { %386 = vmatprep.subr.bf16.mxu1 %v497_v0 }
  0x57   :  { %388 = vmatpush3.bf16.msra.mxu1 %v387_v32 }
 0x114   :  { %v149_v34 = vpop.f32.mrb[0].mxu0 }
 0x115   :  { %v150_v35 = vadd.f32 %v287_v33, %v149_v34  ;;  %v323_v36 = vpop.f32.mrb[1].mxu0 }
 0x117   :  { %v153_v37 = vmax.f32 %v150_v35, 0.0 }
 0x119   :  { %357 = vmatmul.mubr.f32.vlgmr.msra.gmra.mrb[0].mxu1 %v153_v37 }
 0x1ec   :  { %v243_v39 = vpop.f32.mrb[0].mxu1 }
 0x1ed   :  { %v244_v40 = vadd.f32 %v289_v38, %v243_v39  ;;  %v358_v41 = vpop.f32.mrb[1].mxu1 }
 0x1ef   :  { %v247_v43 = vmax.f32 %v244_v40, 0.0 }
 0x1f1   :  { %v255_v44 = vmul.f32 %v290_v42, %v247_v43 }
 0x1f3   :  { %256 = vadd.xlane.f32.xlu0 %v255_v44 }
 0x280   :  { %v257_v50 = vpop.xlane.xlu0 %256 }
 0x281   :  { %v260_v51 = vadd.f32 %v259_v48, %v257_v50 }
 0x283   :  { %v267_v52 = vrot.slane %v260_v51, %v266_v49 }
 0x285   :  { %270 = vst.msk [vmem:[#allocation9] sm:$0x1] %vm269_vm2, %v267_v52 }
 0x286   :  { %475 = shalt.err (!%p472_p0)
}
 0x287   :  { %s476_s6 = scalar_lea.hbm %s614_s7, 16 }
 0x288   :  { %p477_p1 = scmp.ne.s32.totalorder %s614_s7, %s476_s6  ;;  %p480_p2 = scmp.lt.u32.totalorder %s476_s6, %s614_s7 }
 0x28a   :  { %p482_p3 = pnand %p480_p2, %p477_p1 }
 0x28c   :  { %485 = shalt.err (!%p482_p3)
}
 0x28d   :  { %280 = dma.vmem_to_hbm [thread:$0]  %s278_s20, 16, %s614_s7, [#allocation5]  }
 0x28e   :  { %490 = dma.done.wait [#allocation5], 16  }
 0x28f   :  { %491 = vsyncadd [#allocation5], 4294967280 }
 0x290   :  { %284 = vsyncpa [#allocation4], 1 }
 0x291   :  { %285 = vsyncpa [#allocation7], 1 }
 0x292   :  { %286 = vsyncpa [#allocation5], 1 }

</bundles_post_ra>
